<compile_context>
chip_gen: v7x
topology: tpu7x:2x2x1
jax: 0.10.0
libtpu: 0.0.40
codegen_flags: <defaults>
</compile_context>

<pallas_src>
import functools

import jax
import jax.numpy as jnp
from jax import lax
from jax.experimental import pallas as pl
from jax.experimental.pallas import tpu as pltpu

HIDDEN = 30   # fixed by the module definition
_LANE = 128


def _round_up(v, m):
    return ((v + m - 1) // m) * m


def _pick_fold(f):
    """Smallest fold (<=8) that makes fold*f a multiple of 128 lanes; else 8."""
    for cand in (1, 2, 4, 8):
        if (cand * f) % _LANE == 0:
            return cand
    return 8


def _regrenn_kernel(x_ref, w1_ref, b1_ref, w2_ref, b2_ref, o_ref, *, chunk):
    # Weights / biases are VMEM-resident (constant index_map) -> load once.
    w1 = w1_ref[...]          # (fold*F, fold*Hp) bf16, block-diagonal
    b1 = b1_ref[...]          # (1, fold*Hp) f32
    w2 = w2_ref[...]          # (fold*Hp, fold*out) bf16, block-diagonal
    b2 = b2_ref[...]          # (1, fold*out) f32

    n_chunks = o_ref.shape[0] // chunk   # static

    def body(c, carry):
        r = pl.multiple_of(c * chunk, chunk)
        # Load f32 rows, cast to bf16 only at the MXU operand (no wrapper-side copy of x).
        xb = x_ref[pl.ds(r, chunk), :].astype(jnp.bfloat16)
        h = jnp.dot(xb, w1, preferred_element_type=jnp.float32) + b1   # f32 bias add
        m = jnp.maximum(h, 0.0)                                        # f32 ReLU (v5e-safe)
        o = jnp.dot(m.astype(jnp.bfloat16), w2,
                    preferred_element_type=jnp.float32) + b2
        o_ref[pl.ds(r, chunk), :] = o
        return carry

    lax.fori_loop(0, n_chunks, body, 0)


def regrenn_forward(x, w1, b1, w2, b2, *, fold=None,
                    tile_budget_bytes=16 * 1024 * 1024,
                    chunk_rows=512,
                    vmem_limit_bytes=32 * 1024 * 1024):
    """x: [N, F] f32; w1: [F, 30]; b1: [30]; w2: [30, O]; b2: [O] -> [N, O] f32."""
    n, f = x.shape
    hidden = w1.shape[1]
    out = w2.shape[1]
    if fold is None:
        fold = _pick_fold(f)

    # ---- one-time weight prep: pad hidden 30 -> 32, build block-diagonal folded weights ----
    hp = _round_up(hidden, 8)
    w1_pad = jnp.zeros((f, hp), jnp.float32).at[:, :hidden].set(w1.astype(jnp.float32))
    w2_pad = jnp.zeros((hp, out), jnp.float32).at[:hidden, :].set(w2.astype(jnp.float32))
    eye = jnp.eye(fold, dtype=jnp.float32)
    w1_f = jnp.kron(eye, w1_pad).astype(jnp.bfloat16)            # (fold*F, fold*Hp)
    w2_f = jnp.kron(eye, w2_pad).astype(jnp.bfloat16)            # (fold*Hp, fold*out)
    b1_f = jnp.tile(jnp.zeros((hp,), jnp.float32).at[:hidden].set(b1.astype(jnp.float32)),
                    fold).reshape(1, fold * hp)
    b2_f = jnp.tile(b2.astype(jnp.float32), fold).reshape(1, fold * out)

    kf = fold * f          # folded x width   (128 for F=16, fold=8)
    kh = fold * hp         # folded hidden    (256)
    ko = fold * out        # folded out width (32 for O=4)

    # ---- row tile from a VMEM byte budget, with 128-lane-padded accounting ----
    n_folded = _round_up(pl.cdiv(n, fold), 8)
    x_row_b = _round_up(kf, _LANE) * 4        # f32 x row in VMEM
    o_row_b = _round_up(ko, _LANE) * 4        # f32 out row (lane-padded to 128)
    per_row = 2 * (x_row_b + o_row_b)         # double-buffered input + output
    budget_tile = max(chunk_rows,
                      (tile_budget_bytes // per_row) // chunk_rows * chunk_rows)

    grid_n = max(1, pl.cdiv(n_folded, budget_tile))
    if n_folded >= 2 * chunk_rows:
        grid_n = max(grid_n, 2)               # >=2 steps so v7x's second TC isn't idle
    tile = pl.cdiv(n_folded, grid_n)
    if tile >= chunk_rows:
        tile = _round_up(tile, chunk_rows)
        chunk = chunk_rows
    else:
        tile = _round_up(tile, 8)
        chunk = tile
    n_folded_pad = grid_n * tile

    # Pad only the ragged tail (no full-array bf16 cast copy; cast happens in-kernel).
    n_rows = n_folded_pad * fold
    if n_rows != n:
        x = jnp.pad(x, ((0, n_rows - n), (0, 0)))
    x_f = x.reshape(n_folded_pad, kf)          # free row-major view of the batch fold

    cost = pl.CostEstimate(
        flops=2 * n_folded_pad * (kf * kh + kh * ko),
        transcendentals=0,
        bytes_accessed=(n_rows * f * 4                 # x (f32, single read)
                        + n_rows * out * 4             # output (f32)
                        + (kf * kh + kh * ko) * 2      # folded weights (bf16)
                        + (kh + ko) * 4),              # biases (f32)
    )

    out_f = pl.pallas_call(
        functools.partial(_regrenn_kernel, chunk=chunk),
        out_shape=jax.ShapeDtypeStruct((n_folded_pad, ko), jnp.float32),
        grid=(grid_n,),
        in_specs=[
            pl.BlockSpec((tile, kf), lambda i: (i, 0)),    # x: streamed, double-buffered
            pl.BlockSpec((kf, kh), lambda i: (0, 0)),      # W1': VMEM-resident
            pl.BlockSpec((1, kh), lambda i: (0, 0)),       # b1': VMEM-resident
            pl.BlockSpec((kh, ko), lambda i: (0, 0)),      # W2': VMEM-resident
            pl.BlockSpec((1, ko), lambda i: (0, 0)),       # b2': VMEM-resident
        ],
        out_specs=pl.BlockSpec((tile, ko), lambda i: (i, 0)),
        compiler_params=pltpu.CompilerParams(
            dimension_semantics=("parallel",),             # megacore shard on v7x
            vmem_limit_bytes=vmem_limit_bytes,             # explicit scoped-VMEM budget
        ),
        cost_estimate=cost,
    )(x_f, w1_f, b1_f, w2_f, b2_f)

    # Free view back to [N, out], dropping any tail padding.
    return out_f.reshape(n_rows, out)[:n]


def init_params(key, input_feature, output_feature):
    """Deterministic init mimicking torch.nn.Linear's uniform(-1/sqrt(fan_in), 1/sqrt(fan_in))."""
    k1, k2, k3, k4 = jax.random.split(key, 4)
    bound1 = 1.0 / jnp.sqrt(jnp.float32(input_feature))
    bound2 = 1.0 / jnp.sqrt(jnp.float32(HIDDEN))
    w1 = jax.random.uniform(k1, (input_feature, HIDDEN), jnp.float32, -bound1, bound1)
    b1 = jax.random.uniform(k2, (HIDDEN,), jnp.float32, -bound1, bound1)
    w2 = jax.random.uniform(k3, (HIDDEN, output_feature), jnp.float32, -bound2, bound2)
    b2 = jax.random.uniform(k4, (output_feature,), jnp.float32, -bound2, bound2)
    return w1, b1, w2, b2


if __name__ == "__main__":
    input_feature = 16
    output_feature = 4
    batch = 8   # tiny demo size; the kernel is built for large-N inference

    key = jax.random.PRNGKey(0)
    kx, kp = jax.random.split(key)
    x = jax.random.normal(kx, (batch, input_feature), jnp.float32)
    w1, b1, w2, b2 = init_params(kp, input_feature, output_feature)

    out = regrenn_forward(x, w1, b1, w2, b2)
    out = jax.block_until_ready(out)
    assert out.shape == (batch, output_feature)

    # Reference 1: bf16-operand / f32-accumulate path (same math as the kernel, unfolded).
    xb, w1b, w2b = (t.astype(jnp.bfloat16) for t in (x, w1, w2))
    h_ref = jnp.dot(xb, w1b, preferred_element_type=jnp.float32) + b1
    m_ref = jnp.maximum(h_ref, 0.0).astype(jnp.bfloat16)
    ref_bf16 = jnp.dot(m_ref, w2b, preferred_element_type=jnp.float32) + b2
    assert jnp.allclose(out, ref_bf16, atol=1e-3, rtol=1e-3)

    # Reference 2: full-f32 PyTorch-equivalent forward (looser tolerance: bf16 MXU operands).
    ref_f32 = jnp.maximum(x @ w1 + b1, 0.0) @ w2 + b2
    assert jnp.allclose(out, ref_f32, atol=2e-2, rtol=2e-2)

    print("KERNEL_OK")
</pallas_src>

<mosaic_0001>
module attributes {stable_mosaic.version = 11 : i64} {
  func.func @_regrenn_kernel(%arg0: i32, %arg1: memref<8x128xf32, #tpu.memory_space<vmem>>, %arg2: memref<128x256xbf16, #tpu.memory_space<vmem>>, %arg3: memref<1x256xf32, #tpu.memory_space<vmem>>, %arg4: memref<256x32xbf16, #tpu.memory_space<vmem>>, %arg5: memref<1x32xf32, #tpu.memory_space<vmem>>, %arg6: memref<8x32xf32, #tpu.memory_space<vmem>>) attributes {dimension_semantics = [#tpu.dimension_semantics<parallel>], iteration_bounds = array<i64: 1>, scalar_prefetch = 0 : i64, scratch_operands = 0 : i64, tpu.core_type = #tpu.core_type<tc>, window_params = [{transform_indices = @transform_0, window_bounds = array<i64: 8, 128>}, {pipeline_mode = #tpu.pipeline_mode<synchronous>, transform_indices = @transform_1, window_bounds = array<i64: 128, 256>}, {pipeline_mode = #tpu.pipeline_mode<synchronous>, transform_indices = @transform_2, window_bounds = array<i64: 1, 256>}, {pipeline_mode = #tpu.pipeline_mode<synchronous>, transform_indices = @transform_3, window_bounds = array<i64: 256, 32>}, {pipeline_mode = #tpu.pipeline_mode<synchronous>, transform_indices = @transform_4, window_bounds = array<i64: 1, 32>}, {transform_indices = @transform_5, window_bounds = array<i64: 8, 32>}]} {
    %c0 = arith.constant 0 : index
    %c0_0 = arith.constant 0 : index
    %0 = vector.load %arg2[%c0, %c0_0] : memref<128x256xbf16, #tpu.memory_space<vmem>>, vector<128x256xbf16>
    %c0_1 = arith.constant 0 : index
    %c0_2 = arith.constant 0 : index
    %1 = vector.load %arg3[%c0_1, %c0_2] : memref<1x256xf32, #tpu.memory_space<vmem>>, vector<1x256xf32>
    %c0_3 = arith.constant 0 : index
    %c0_4 = arith.constant 0 : index
    %2 = vector.load %arg4[%c0_3, %c0_4] : memref<256x32xbf16, #tpu.memory_space<vmem>>, vector<256x32xbf16>
    %c0_5 = arith.constant 0 : index
    %c0_6 = arith.constant 0 : index
    %3 = vector.load %arg5[%c0_5, %c0_6] : memref<1x32xf32, #tpu.memory_space<vmem>>, vector<1x32xf32>
    %c0_i32 = arith.constant 0 : i32
    %c8_i32 = arith.constant 8 : i32
    %4 = arith.muli %c0_i32, %c8_i32 : i32
    %5 = tpu.assume_multiple %4, 8 : i32
    %6 = arith.index_cast %5 : i32 to index
    %c0_7 = arith.constant 0 : index
    %7 = vector.load %arg1[%6, %c0_7] : memref<8x128xf32, #tpu.memory_space<vmem>>, vector<8x128xf32>
    %8 = arith.truncf %7 : vector<8x128xf32> to vector<8x128xbf16>
    %cst = arith.constant dense<0.000000e+00> : vector<8x256xf32>
    %9 = tpu.matmul %8, %0, %cst {dimension_numbers = #tpu.dot_dimension_numbers<[1], [0], [0], [1], [0, 0, 1, 1], [], []>} : vector<8x128xbf16>, vector<128x256xbf16>, vector<8x256xf32> -> vector<8x256xf32>
    %10 = vector.broadcast %1 : vector<1x256xf32> to vector<8x256xf32>
    %11 = arith.addf %9, %10 : vector<8x256xf32>
    %cst_8 = arith.constant 0.000000e+00 : f32
    %12 = vector.broadcast %cst_8 : f32 to vector<8x256xf32>
    %13 = arith.maximumf %11, %12 : vector<8x256xf32>
    %14 = arith.truncf %13 : vector<8x256xf32> to vector<8x256xbf16>
    %cst_9 = arith.constant dense<0.000000e+00> : vector<8x32xf32>
    %15 = tpu.matmul %14, %2, %cst_9 {dimension_numbers = #tpu.dot_dimension_numbers<[1], [0], [0], [1], [0, 0, 1, 1], [], []>} : vector<8x256xbf16>, vector<256x32xbf16>, vector<8x32xf32> -> vector<8x32xf32>
    %16 = vector.broadcast %3 : vector<1x32xf32> to vector<8x32xf32>
    %17 = arith.addf %15, %16 : vector<8x32xf32>
    %18 = arith.index_cast %5 : i32 to index
    %c0_10 = arith.constant 0 : index
    %19 = vector.load %arg6[%18, %c0_10] : memref<8x32xf32, #tpu.memory_space<vmem>>, vector<8x32xf32>
    tpu.vector_store %arg6[%18, %c0_10], %17 {strides = array<i32>} : memref<8x32xf32, #tpu.memory_space<vmem>>, vector<8x32xf32>,
    %c1_i32 = arith.constant 1 : i32
    return
  }
  func.func @transform_0(%arg0: i32) -> (i32, i32) {
    %c0_i32 = arith.constant 0 : i32
    %c0_i32_0 = arith.constant 0 : i32
    return %arg0, %c0_i32 : i32, i32
  }
  func.func @transform_1(%arg0: i32) -> (i32, i32) {
    %c0_i32 = arith.constant 0 : i32
    %c0_i32_0 = arith.constant 0 : i32
    %c0_i32_1 = arith.constant 0 : i32
    return %c0_i32, %c0_i32_0 : i32, i32
  }
  func.func @transform_2(%arg0: i32) -> (i32, i32) {
    %c0_i32 = arith.constant 0 : i32
    %c0_i32_0 = arith.constant 0 : i32
    %c0_i32_1 = arith.constant 0 : i32
    return %c0_i32, %c0_i32_0 : i32, i32
  }
  func.func @transform_3(%arg0: i32) -> (i32, i32) {
    %c0_i32 = arith.constant 0 : i32
    %c0_i32_0 = arith.constant 0 : i32
    %c0_i32_1 = arith.constant 0 : i32
    return %c0_i32, %c0_i32_0 : i32, i32
  }
  func.func @transform_4(%arg0: i32) -> (i32, i32) {
    %c0_i32 = arith.constant 0 : i32
    %c0_i32_0 = arith.constant 0 : i32
    %c0_i32_1 = arith.constant 0 : i32
    return %c0_i32, %c0_i32_0 : i32, i32
  }
  func.func @transform_5(%arg0: i32) -> (i32, i32) {
    %c0_i32 = arith.constant 0 : i32
    %c0_i32_0 = arith.constant 0 : i32
    return %arg0, %c0_i32 : i32, i32
  }
}

</mosaic_0001>

<bundles_post_ra>
// kernel: tpu_custom_call.1
= control target key start
LH: loop header
LB: loop body
LE: loop exit
PB: predicated region body
PF: predicated region fallthrough
CT: control target
= control target key end

     0   :  { %v489_v2 = vmov 0   ;;  %s638_s0 = inlined_call_operand.vmem [shape: f32[8,128], index: 0, kind: input, shape index: {}]   ;;  %s639_s1 = inlined_call_operand.vmem [shape: bf16[128,256], index: 1, kind: input, shape index: {}]   ;;  %s640_s2 = inlined_call_operand.vmem [shape: f32[1,256], index: 2, kind: input, shape index: {}]   ;;  %s641_s3 = inlined_call_operand.vmem [shape: bf16[256,32], index: 3, kind: input, shape index: {}]   ;;  %s642_s4 = inlined_call_operand.vmem [shape: f32[1,32], index: 4, kind: input, shape index: {}]   ;;  %s643_s5 = inlined_call_operand.hbm [shape: f32[8,32], index: 5, kind: output, shape index: {}]  }
   0x1   :  { %v425_v0 = vld [vmem:[%s639_s1 + $0x4] ss:$8 sps:$4 sm:$0xff]   ;;  %v427_v1 = vld [vmem:[%s639_s1] ss:$8 sps:$4 sm:$0xff]   ;;  %197 = vmatprep.mubr.bf16.mxu0 %v489_v2  ;;  %v428_v3 = vld [vmem:[%s639_s1 + $0x14] ss:$8 sps:$4 sm:$0xff]  }
   0x2   :  { %165 = vmatprep.subr.bf16.mxu0 %v425_v0  ;;  %v430_v4 = vld [vmem:[%s639_s1 + $0x10] ss:$8 sps:$4 sm:$0xff]   ;;  %v431_v5 = vld [vmem:[%s639_s1 + $0x24] ss:$8 sps:$4 sm:$0xff]   ;;  %v433_v6 = vld [vmem:[%s639_s1 + $0x20] ss:$8 sps:$4 sm:$0xff]  }
   0x3   :  { %166 = vmatpush1.bf16.msra.mxu0 %v427_v1  ;;  %v434_v7 = vld [vmem:[%s639_s1 + $0x34] ss:$8 sps:$4 sm:$0xff]   ;;  %v436_v8 = vld [vmem:[%s639_s1 + $0x30] ss:$8 sps:$4 sm:$0xff]   ;;  %v437_v9 = vld [vmem:[%s639_s1 + $0x44] ss:$8 sps:$4 sm:$0xff]  }
   0x4   :  { %167 = vmatprep.subr.bf16.mxu0 %v428_v3  ;;  %v449_v10 = vld [vmem:[%s641_s3 + $0x40] sm:$0xff]   ;;  %v451_v13 = vld [vmem:[%s641_s3 + $0x48] sm:$0xff]   ;;  %v453_v15 = vld [vmem:[%s641_s3 + $0x50] sm:$0xff]  }
   0x5   :  { %v450_v11 = vld [vmem:[%s641_s3] sm:$0xff]   ;;  %401 = vmatprep.subr.bf16.mxu1 %v449_v10  ;;  %v452_v14 = vld [vmem:[%s641_s3 + $0x8] sm:$0xff]   ;;  %v440_v16 = vld [vmem:[%s639_s1 + $0x54] ss:$8 sps:$4 sm:$0xff]  }
   0x6   :  { %v439_v12 = vld [vmem:[%s639_s1 + $0x40] ss:$8 sps:$4 sm:$0xff]   ;;  %402 = vmatpush3.bf16.msra.mxu1 %v450_v11  ;;  %v442_v17 = vld [vmem:[%s639_s1 + $0x50] ss:$8 sps:$4 sm:$0xff]   ;;  %v443_v20 = vld [vmem:[%s639_s1 + $0x64] ss:$8 sps:$4 sm:$0xff]  }
   0x7   :  { %168 = vmatpush1.bf16.msra.mxu0 %v430_v4  ;;  %403 = vmatprep.subr.bf16.mxu1 %v451_v13  ;;  %v454_v18 = vld [vmem:[%s641_s3 + $0x10] sm:$0xff]   ;;  %v455_v19 = vld [vmem:[%s641_s3 + $0x58] sm:$0xff]   ;;  %v445_v21 = vld [vmem:[%s639_s1 + $0x60] ss:$8 sps:$4 sm:$0xff]  }
   0x8   :  { %169 = vmatprep.subr.bf16.mxu0 %v431_v5  ;;  %v446_v22 = vld [vmem:[%s639_s1 + $0x74] ss:$8 sps:$4 sm:$0xff]   ;;  %v457_v24 = vld [vmem:[%s641_s3 + $0x60] sm:$0xff]  }
   0x9   :  { %v456_v23 = vld [vmem:[%s641_s3 + $0x18] sm:$0xff]   ;;  %v458_v25 = vld [vmem:[%s641_s3 + $0x20] sm:$0xff]  }
   0xa   :  { %404 = vmatpush3.bf16.msra.mxu1 %v452_v14 }
   0xb   :  { %170 = vmatpush1.bf16.msra.mxu0 %v433_v6  ;;  %405 = vmatprep.subr.bf16.mxu1 %v453_v15 }
   0xc   :  { %171 = vmatprep.subr.bf16.mxu0 %v434_v7 }
   0xe   :  { %406 = vmatpush3.bf16.msra.mxu1 %v454_v18 }
   0xf   :  { %172 = vmatpush1.bf16.msra.mxu0 %v436_v8  ;;  %407 = vmatprep.subr.bf16.mxu1 %v455_v19 }
  0x10   :  { %173 = vmatprep.subr.bf16.mxu0 %v437_v9 }
  0x12   :  { %408 = vmatpush3.bf16.msra.mxu1 %v456_v23 }
  0x13   :  { %174 = vmatpush1.bf16.msra.mxu0 %v439_v12 }
  0x14   :  { %175 = vmatprep.subr.bf16.mxu0 %v440_v16 }
  0x17   :  { %176 = vmatpush1.bf16.msra.mxu0 %v442_v17 }
  0x18   :  { %177 = vmatprep.subr.bf16.mxu0 %v443_v20 }
  0x19   :  { %10 = vsyncpa [#allocation3], 0  ;;  %v448_v26 = vld [vmem:[%s639_s1 + $0x70] ss:$8 sps:$4 sm:$0xff]   ;;  %v72_v27 = vld [vmem:[%s638_s0] sm:$0xff]  ;;  %409 = vmatprep.subr.bf16.mxu1 %v457_v24  ;;  %v75_v35 = vlaneseq  ;;  %vm352_vm0 = vcmask 261120  }
  0x1a   :  { %v459_v28 = vld [vmem:[%s641_s3 + $0x68] sm:$0xff]   ;;  %v73_v29 = vpack.c.bf16 %v72_v27, %v72_v27  ;;  %410 = vmatpush3.bf16.msra.mxu1 %v458_v25  ;;  %v461_v31 = vld [vmem:[%s641_s3 + $0x70] sm:$0xff]   ;;  %v463_v33 = vld [vmem:[%s641_s3 + $0x78] sm:$0xff]  }
  0x1b   :  { %178 = vmatpush1.bf16.msra.mxu0 %v445_v21  ;;  %v460_v30 = vld [vmem:[%s641_s3 + $0x28] sm:$0xff]   ;;  %411 = vmatprep.subr.bf16.mxu1 %v459_v28  ;;  %v462_v32 = vld [vmem:[%s641_s3 + $0x30] sm:$0xff]   ;;  %v464_v34 = vld [vmem:[%s641_s3 + $0x38] sm:$0xff]   ;;  %v76_v36 = vshrl.u32 %v75_v35, 7 }
  0x1c   :  { %179 = vmatprep.subr.bf16.mxu0 %v446_v22  ;;  %v38_v38 = vld [vmem:[%s640_s2] sm:$0x3]  ;;  %s490_s2 = smov [#allocation2]  }
  0x1d   :  { %v77_v37 = vsub.s32 0, %v76_v36  ;;  %v81_v39 = vsub.s32 1, %v76_v36  ;;  %v384_v53 = vld [vmem:[%s642_s4] ss:$0 sm:$0xff]  ;;  %s360_s10 = sshll.u32 %s490_s2, 4  ;;  %s361_s10 = int_to_ptr.vmem [resolvable:$true] %s360_s10 }
  0x1e   :  { %412 = vmatpush3.bf16.msra.mxu1 %v460_v30  ;;  %s465_s11 = scalar_lea.vmem %s361_s10, 128  ;;  %p470_p1 = scmp.lt.s32.totalorder %s361_s10, %s361_s10 }
  0x1f   :  { %180 = vmatpush1.bf16.msra.mxu0 %v448_v26  ;;  %413 = vmatprep.subr.bf16.mxu1 %v461_v31  ;;  %v78_v40 = vrot.slane %v38_v38, %v77_v37  ;;  %v82_v41 = vrot.slane %v38_v38, %v81_v39  ;;  %p466_p0 = scmp.ne.s32.totalorder %s361_s10, %s465_s11  ;;  %p471_p2 = scmp.lt.s32.totalorder %s465_s11, %s465_s11 }
  0x21   :  { %p472_p3 = por %p471_p2, %p470_p1 }
  0x22   :  { %198 = vmatmul.mubr.bf16.vlgmr.msra.gmra.mrb[0].mxu0 %v73_v29  ;;  %414 = vmatpush3.bf16.msra.mxu1 %v462_v32 }
  0x23   :  { %415 = vmatprep.subr.bf16.mxu1 %v463_v33  ;;  %p473_p4 = pnand %p472_p3, %p466_p0 }
  0x26   :  { %416 = vmatpush3.bf16.msra.mxu1 %v464_v34 }
  0xf5   :  { %v199_v42 = vpop.f32.mrb[0].mxu0 }
  0xf6   :  { %v200_v43 = vadd.f32 %v199_v42, %v78_v40  ;;  %v201_v44 = vpop.f32.mrb[1].mxu0 }
  0xf7   :  { %v202_v45 = vadd.f32 %v201_v44, %v82_v41  ;;  %v203_v46 = vpop.f32.mrb[2].mxu0 }
  0xf8   :  { %v206_v47 = vmax.f32 %v200_v43, 0.0  ;;  %v204_v48 = vpop.f32.mrb[3].mxu0 }
  0xf9   :  { %v207_v49 = vmax.f32 %v202_v45, 0.0 }
  0xfa   :  { %v208_v51 = vpack.c.bf16 %v206_v47, %v206_v47 }
  0xfb   :  { %v209_v50 = vpack.c.bf16 %v207_v49, %v207_v49 }
  0xfd   :  { %344 = vmatprep.mubr.bf16.mxu1 %v209_v50 }
  0xfe   :  { %345 = vmatmul.mubr.bf16.vlgmr.msra.gmra.mrb[0].mxu1 %v208_v51 }
 0x1d1   :  { %v417_v52 = vpop.f32.mrb[0].mxu1 }
 0x1d2   :  { %v418_v54 = vpop.f32.mrb[1].mxu1 }
 0x1d3   :  { %v419_v55 = vadd.f32 %v418_v54, %v417_v52  ;;  %v420_v56 = vpop.f32.mrb[2].mxu1 }
 0x1d4   :  { %v421_v57 = vpop.f32.mrb[3].mxu1 }
 0x1d5   :  { %v347_v58 = vadd.f32 %v419_v55, %v384_v53 }
 0x1d7   :  { %353 = vst.msk [vmem:[#allocation2] sm:$0xff] %vm352_vm0, %v347_v58 }
 0x1d8   :  { %476 = shalt.err (!%p473_p4)
}
 0x1d9   :  { %s477_s4 = scalar_lea.hbm %s643_s5, 128 }
 0x1da   :  { %p478_p5 = scmp.ne.s32.totalorder %s643_s5, %s477_s4  ;;  %p481_p6 = scmp.lt.u32.totalorder %s477_s4, %s643_s5 }
 0x1dc   :  { %p483_p7 = pnand %p481_p6, %p478_p5 }
 0x1de   :  { %486 = shalt.err (!%p483_p7)
}
 0x1df   :  { %363 = dma.vmem_to_hbm [thread:$0]  %s361_s10, 128, %s643_s5, [#allocation3]  }
 0x1e0   :  { %487 = dma.done.wait [#allocation3], 128  }
 0x1e1   :  { %488 = vsyncadd [#allocation3], 4294967168 }
 0x1e2   :  { %367 = vsyncpa [#allocation3], 1 }

</bundles_post_ra>
